<compile_context>
chip_gen: v6e
topology: v6e:2x2x1
jax: 0.10.0
libtpu: 0.0.40
codegen_flags: <defaults>
</compile_context>

<pallas_src>
import functools

import jax
import jax.numpy as jnp
from jax.experimental import pallas as pl
from jax.experimental.pallas import tpu as pltpu

_EPS = 1e-6
_SCAN_MIN_C = 2048               # switch from tri-matmul cumsum to roll-based scan
_DEFAULT_MAX_TILE_ROWS = 8192


def _vmem_capacity_bytes():
    """Physical VMEM of the local TPU generation (conservative 64 MiB fallback)."""
    try:
        cap = getattr(pltpu.get_tpu_info(), "vmem_capacity_bytes", None)
        if cap:
            return int(cap)
    except Exception:
        pass
    return 64 << 20


def _lane_prefix_sum(x):
    """Inclusive prefix sum along the lane (last) axis via log2(C) shifted adds."""
    # TODO(synk): validate pltpu.roll shift-direction on hardware for this large-C
    # path (only taken for C >= _SCAN_MIN_C); the tri-matmul path is what the
    # small/medium-C tests below exercise.
    C = x.shape[-1]
    lane = jax.lax.broadcasted_iota(jnp.int32, x.shape, x.ndim - 1)
    shift = 1
    while shift < C:
        shifted = pltpu.roll(x, shift, axis=x.ndim - 1)
        x = x + jnp.where(lane >= shift, shifted, 0.0)
        shift *= 2
    return x


def _smooth_cad_kernel(pred_ref, targ_ref, out_ref, *scratch,
                       reduction, batch, tile_b, grid_inner, use_tri):
    p_outer = pl.program_id(0)              # "parallel": sharded across TCs (v7x)
    j_inner = pl.program_id(1)              # "arbitrary": serial sweep over B tiles
    i_tile = p_outer * grid_inner + j_inner  # global B-tile index (may overshoot)
    C = pred_ref.shape[1]

    if use_tri:
        tri_ref = scratch[0]

        # Fill the upper-triangular ones matrix once per core, not every grid step.
        @pl.when(j_inner == 0)
        def _():
            k_idx = jax.lax.broadcasted_iota(jnp.int32, (C, C), 0)
            j_idx = jax.lax.broadcasted_iota(jnp.int32, (C, C), 1)
            tri_ref[...] = jnp.where(k_idx <= j_idx, 1.0, 0.0).astype(jnp.float32)

    # clamp(min=0) and row-normalize (sum floored at 1e-8), as in the torch ref.
    # One reciprocal per row (EUP) + broadcast multiply (VPU) instead of a full
    # (tile_b, C) divide.  Padded/garbage rows are left unmasked here: every op
    # below is row-local, and the final per-row mask on cad zeroes them.
    p = jnp.maximum(pred_ref[...].astype(jnp.float32), 0.0)
    t = jnp.maximum(targ_ref[...].astype(jnp.float32), 0.0)
    p = p * pl.reciprocal(jnp.maximum(jnp.sum(p, axis=1, keepdims=True), 1e-8))
    t = t * pl.reciprocal(jnp.maximum(jnp.sum(t, axis=1, keepdims=True), 1e-8))

    # cdf_pred - cdf_target == cumsum(p - t, axis=1).
    d = p - t
    if use_tri:
        # MXU cumsum: (d @ T)[b, j] = sum_{k <= j} d[b, k]; tri lives in scratch.
        cdf_diff = jnp.dot(d, tri_ref[...], preferred_element_type=jnp.float32)
    else:
        # Large C: O(C log C) roll-based scan, no O(C^2) tri buffer.
        cdf_diff = _lane_prefix_sum(d)

    s = jnp.sqrt(cdf_diff * cdf_diff + _EPS)                  # (tile_b, C)

    if reduction == "none":
        # Lane-dense per-row CAD: cad[0, b] = sum_c s[b, c] via an M=1 MXU pass.
        # TODO(synk): confirm with pl.lower_as_mlir that this transposed-RHS
        # contraction does not insert an explicit XLU transpose of s.
        ones_row = jnp.ones((1, C), dtype=jnp.float32)
        cad = jax.lax.dot_general(
            ones_row, s,
            dimension_numbers=(((1,), (1,)), ((), ())),
            preferred_element_type=jnp.float32)               # (1, tile_b)
        lane_ids = i_tile * tile_b + jax.lax.broadcasted_iota(
            jnp.int32, (1, tile_b), 1)
        out_ref[...] = jnp.where(lane_ids < batch, cad, 0.0)
    else:
        # Per-core partial sum, accumulated across the inner ("arbitrary") axis.
        row_ids = i_tile * tile_b + jax.lax.broadcasted_iota(
            jnp.int32, (tile_b, 1), 0)
        cad_col = jnp.sum(s, axis=1, keepdims=True)           # (tile_b, 1)
        cad_col = jnp.where(row_ids < batch, cad_col, 0.0)
        partial = jnp.sum(cad_col, axis=0, keepdims=True)     # (1, 1)

        @pl.when(j_inner == 0)
        def _():
            out_ref[...] = jnp.zeros_like(out_ref)

        out_ref[...] = out_ref[...] + jnp.broadcast_to(partial, out_ref.shape)


def _choose_tile_b(batch, channels, itemsize, vmem_cap, max_tile_rows):
    """Pick (tile_b, num_tiles): byte-budgeted, generation-aware B tiling.

    ~4 MiB per f32 input tile on 128 MiB-VMEM parts (v5e/v6e), ~2 MiB on 64 MiB
    parts (v7x), up to `max_tile_rows` rows.  Multi-tile sizes are multiples of
    128 so the lane-dense 'none' output blocks store unmasked.
    """
    C = max(channels, 1)
    big_vmem = vmem_cap >= (100 << 20)
    tile_budget = (4 << 20) if big_vmem else (2 << 20)
    cap = tile_budget // (4 * C)
    cap = max(128, (cap // 128) * 128)
    cap = min(cap, max_tile_rows)
    # Minimal sublane multiple for the input dtype (f32: 8, bf16: 16, 8-bit: 32).
    sub_mult = max(8, 32 // max(int(itemsize), 1))
    b_full = max(sub_mult, pl.cdiv(batch, sub_mult) * sub_mult)
    if b_full <= cap:
        return b_full, 1
    return cap, pl.cdiv(batch, cap)


def smooth_cad_loss(predicted, target, reduction: str = "mean",
                    max_tile_rows: int = _DEFAULT_MAX_TILE_ROWS):
    """Pallas TPU implementation of SmoothCADLoss.forward.

    predicted, target: (B, C) arrays (any float dtype). Returns a float32 scalar
    for 'mean'/'sum', or a float32 (B,) vector for 'none'.
    """
    assert predicted.shape == target.shape and predicted.ndim == 2
    assert reduction in ("mean", "sum", "none")
    B, C = predicted.shape

    vmem_cap = _vmem_capacity_bytes()
    itemsize = min(predicted.dtype.itemsize, target.dtype.itemsize)
    tile_b, grid_b = _choose_tile_b(B, C, itemsize, vmem_cap, max_tile_rows)

    use_tri = (C < _SCAN_MIN_C) or (C % 128 != 0)
    n_par = 2 if grid_b >= 2 else 1              # per-core partials / tile sharding
    grid_inner = pl.cdiv(grid_b, n_par)

    kernel = functools.partial(
        _smooth_cad_kernel, reduction=reduction, batch=B, tile_b=tile_b,
        grid_inner=grid_inner, use_tri=use_tri)

    def in_map(p, j):
        # Clamp the (rare) overshoot tile when grid_b is odd; the kernel masks its
        # rows out, so re-reading the last real tile is harmless.
        return (jnp.minimum(p * grid_inner + j, grid_b - 1), 0)

    in_specs = [pl.BlockSpec((tile_b, C), in_map),
                pl.BlockSpec((tile_b, C), in_map)]
    scratch_shapes = [pltpu.VMEM((C, C), jnp.float32)] if use_tri else []

    if reduction == "none":
        out_shape = jax.ShapeDtypeStruct((1, n_par * grid_inner * tile_b),
                                         jnp.float32)
        out_specs = pl.BlockSpec((1, tile_b), lambda p, j: (0, p * grid_inner + j))
    else:
        out_shape = jax.ShapeDtypeStruct((1, n_par * 128), jnp.float32)
        out_specs = pl.BlockSpec((1, 128), lambda p, j: (0, p))

    # Generation-aware VMEM limit: 2 inputs x 2 buffers (f32-sized worst case),
    # ~6 f32 temps, the (C, C) tri scratch, plus slack — capped below physical.
    tri_bytes = 4 * C * C if use_tri else 0
    est = 4 * tile_b * C * (2 * 2 + 6) + tri_bytes + (2 << 20)
    limit_cap = (100 << 20) if vmem_cap >= (100 << 20) else (48 << 20)
    vmem_limit = int(min(limit_cap, max(32 << 20, est)))

    out = pl.pallas_call(
        kernel,
        out_shape=out_shape,
        grid=(n_par, grid_inner),
        in_specs=in_specs,
        out_specs=out_specs,
        scratch_shapes=scratch_shapes,
        compiler_params=pltpu.CompilerParams(
            dimension_semantics=("parallel", "arbitrary"),
            vmem_limit_bytes=vmem_limit,
        ),
    )(predicted, target)

    if reduction == "none":
        return out[0, :B]
    total = jnp.sum(out.reshape(n_par, 128)[:, 0])
    if reduction == "mean":
        return total / B
    return total


def _reference(predicted, target, reduction="mean"):
    # Plain-JAX reference mirroring the PyTorch forward, for a sanity check.
    eps = 1e-6
    p = jnp.maximum(predicted.astype(jnp.float32), 0.0)
    p = p / jnp.maximum(jnp.sum(p, axis=1, keepdims=True), 1e-8)
    t = jnp.maximum(target.astype(jnp.float32), 0.0)
    t = t / jnp.maximum(jnp.sum(t, axis=1, keepdims=True), 1e-8)
    cdf_p = jnp.cumsum(p, axis=1)
    cdf_t = jnp.cumsum(t, axis=1)
    cad = jnp.sum(jnp.sqrt((cdf_p - cdf_t) ** 2 + eps), axis=1)
    if reduction == "mean":
        return jnp.mean(cad)
    if reduction == "sum":
        return jnp.sum(cad)
    return cad


if __name__ == "__main__":
    key = jax.random.PRNGKey(0)
    kp, kt = jax.random.split(key)
    B, C = 8, 32
    # Raw (unnormalized, possibly negative) score distributions.
    predicted = jax.random.normal(kp, (B, C), dtype=jnp.float32) + 0.5
    target = jax.random.uniform(kt, (B, C), dtype=jnp.float32)

    # 'mean' (accumulating partial-sum path).
    loss = jax.block_until_ready(smooth_cad_loss(predicted, target, reduction="mean"))
    ref = _reference(predicted, target, reduction="mean")
    assert bool(jnp.allclose(loss, ref, rtol=1e-5, atol=1e-5)), (loss, ref)

    # 'none' (lane-dense per-row path).
    per_row = jax.block_until_ready(smooth_cad_loss(predicted, target, reduction="none"))
    per_row_ref = _reference(predicted, target, reduction="none")
    assert bool(jnp.allclose(per_row, per_row_ref, rtol=1e-5, atol=1e-5))

    # 'sum' with B not a multiple of 8, exercising partial-tile masking.
    p5, t5 = predicted[:5], target[:5]
    loss_sum = jax.block_until_ready(smooth_cad_loss(p5, t5, reduction="sum"))
    ref_sum = _reference(p5, t5, reduction="sum")
    assert bool(jnp.allclose(loss_sum, ref_sum, rtol=1e-5, atol=1e-5)), (loss_sum, ref_sum)

    # Native bf16 inputs (kernel casts on load; 16-row sublane multiple handled).
    p_bf = predicted.astype(jnp.bfloat16)
    t_bf = target.astype(jnp.bfloat16)
    loss_bf = jax.block_until_ready(smooth_cad_loss(p_bf, t_bf, reduction="mean"))
    ref_bf = _reference(p_bf, t_bf, reduction="mean")
    assert bool(jnp.allclose(loss_bf, ref_bf, rtol=1e-4, atol=1e-4)), (loss_bf, ref_bf)

    # Multi-tile / two-way-partial path, forced via a small max_tile_rows so the
    # 2-D (parallel, arbitrary) grid, the clamped overshoot tile and the in-kernel
    # accumulation are exercised at small size (B=300 -> 3 tiles of 128 rows).
    kb, kc = jax.random.split(kt)
    B2 = 300
    pred2 = jax.random.normal(kb, (B2, C), dtype=jnp.float32) + 0.5
    targ2 = jax.random.uniform(kc, (B2, C), dtype=jnp.float32)
    loss2 = jax.block_until_ready(
        smooth_cad_loss(pred2, targ2, reduction="mean", max_tile_rows=128))
    ref2 = _reference(pred2, targ2, reduction="mean")
    assert bool(jnp.allclose(loss2, ref2, rtol=1e-5, atol=1e-5)), (loss2, ref2)

    per_row2 = jax.block_until_ready(
        smooth_cad_loss(pred2, targ2, reduction="none", max_tile_rows=128))
    per_row2_ref = _reference(pred2, targ2, reduction="none")
    assert bool(jnp.allclose(per_row2, per_row2_ref, rtol=1e-5, atol=1e-5))

    print("KERNEL_OK")
</pallas_src>

<mosaic_0001>
module attributes {stable_mosaic.version = 11 : i64} {
  func.func @_smooth_cad_kernel(%arg0: i32, %arg1: i32, %arg2: memref<8x32xf32, #tpu.memory_space<vmem>>, %arg3: memref<8x32xf32, #tpu.memory_space<vmem>>, %arg4: memref<1x128xf32, #tpu.memory_space<vmem>>, %arg5: memref<32x32xf32, #tpu.memory_space<vmem>>) attributes {dimension_semantics = [#tpu.dimension_semantics<parallel>, #tpu.dimension_semantics<arbitrary>], iteration_bounds = array<i64: 1, 1>, scalar_prefetch = 0 : i64, scratch_operands = 1 : i64, tpu.core_type = #tpu.core_type<tc>, window_params = [{transform_indices = @transform_0, window_bounds = array<i64: 8, 32>}, {transform_indices = @transform_1, window_bounds = array<i64: 8, 32>}, {transform_indices = @transform_2, window_bounds = array<i64: 1, 128>}]} {
    %c1_i32 = arith.constant 1 : i32
    %0 = arith.muli %arg0, %c1_i32 : i32
    %1 = arith.addi %0, %arg1 : i32
    %c0_i32 = arith.constant 0 : i32
    %2 = arith.cmpi eq, %arg1, %c0_i32 : i32
    %3 = arith.extui %2 : i1 to i32
    %c0_i32_0 = arith.constant 0 : i32
    %4 = arith.cmpi ne, %3, %c0_i32_0 : i32
    scf.if %4 {
      %52 = tpu.iota {dimensions = array<i32: 0>} : vector<32x32xi32>
      %53 = tpu.iota {dimensions = array<i32: 1>} : vector<32x32xi32>
      %54 = arith.cmpi sle, %52, %53 : vector<32x32xi32>
      %cst_23 = arith.constant 1.000000e+00 : f32
      %cst_24 = arith.constant 0.000000e+00 : f32
      %55 = vector.broadcast %cst_23 : f32 to vector<32x32xf32>
      %56 = vector.broadcast %cst_24 : f32 to vector<32x32xf32>
      %57 = arith.select %54, %55, %56 : vector<32x32xi1>, vector<32x32xf32>
      %c0_25 = arith.constant 0 : index
      %c0_26 = arith.constant 0 : index
      %58 = vector.load %arg5[%c0_25, %c0_26] : memref<32x32xf32, #tpu.memory_space<vmem>>, vector<32x32xf32>
      tpu.vector_store %arg5[%c0_25, %c0_26], %57 {strides = array<i32>} : memref<32x32xf32, #tpu.memory_space<vmem>>, vector<32x32xf32>,
    } else {
    }
    %c0 = arith.constant 0 : index
    %c0_1 = arith.constant 0 : index
    %5 = vector.load %arg2[%c0, %c0_1] : memref<8x32xf32, #tpu.memory_space<vmem>>, vector<8x32xf32>
    %cst = arith.constant 0.000000e+00 : f32
    %6 = vector.broadcast %cst : f32 to vector<8x32xf32>
    %7 = arith.maximumf %5, %6 : vector<8x32xf32>
    %c0_2 = arith.constant 0 : index
    %c0_3 = arith.constant 0 : index
    %8 = vector.load %arg3[%c0_2, %c0_3] : memref<8x32xf32, #tpu.memory_space<vmem>>, vector<8x32xf32>
    %cst_4 = arith.constant 0.000000e+00 : f32
    %9 = vector.broadcast %cst_4 : f32 to vector<8x32xf32>
    %10 = arith.maximumf %8, %9 : vector<8x32xf32>
    %cst_5 = arith.constant dense<0.000000e+00> : vector<8xf32>
    %11 = vector.multi_reduction <add>, %7, %cst_5 [1] : vector<8x32xf32> to vector<8xf32>
    %12 = vector.shape_cast %11 : vector<8xf32> to vector<8x1xf32>
    %cst_6 = arith.constant 9.99999993E-9 : f32
    %13 = vector.broadcast %cst_6 : f32 to vector<8x1xf32>
    %14 = arith.maximumf %12, %13 : vector<8x1xf32>
    %15 = tpu.reciprocal %14 : vector<8x1xf32> -> vector<8x1xf32>
    %16 = vector.broadcast %15 : vector<8x1xf32> to vector<8x32xf32>
    %17 = arith.mulf %7, %16 : vector<8x32xf32>
    %cst_7 = arith.constant dense<0.000000e+00> : vector<8xf32>
    %18 = vector.multi_reduction <add>, %10, %cst_7 [1] : vector<8x32xf32> to vector<8xf32>
    %19 = vector.shape_cast %18 : vector<8xf32> to vector<8x1xf32>
    %cst_8 = arith.constant 9.99999993E-9 : f32
    %20 = vector.broadcast %cst_8 : f32 to vector<8x1xf32>
    %21 = arith.maximumf %19, %20 : vector<8x1xf32>
    %22 = tpu.reciprocal %21 : vector<8x1xf32> -> vector<8x1xf32>
    %23 = vector.broadcast %22 : vector<8x1xf32> to vector<8x32xf32>
    %24 = arith.mulf %10, %23 : vector<8x32xf32>
    %25 = arith.subf %17, %24 : vector<8x32xf32>
    %c0_9 = arith.constant 0 : index
    %c0_10 = arith.constant 0 : index
    %26 = vector.load %arg5[%c0_9, %c0_10] : memref<32x32xf32, #tpu.memory_space<vmem>>, vector<32x32xf32>
    %cst_11 = arith.constant dense<0.000000e+00> : vector<8x32xf32>
    %27 = tpu.matmul %25, %26, %cst_11 {dimension_numbers = #tpu.dot_dimension_numbers<[1], [0], [0], [1], [0, 0, 1, 1], [], []>} : vector<8x32xf32>, vector<32x32xf32>, vector<8x32xf32> -> vector<8x32xf32>
    %28 = arith.mulf %27, %27 : vector<8x32xf32>
    %cst_12 = arith.constant 9.99999997E-7 : f32
    %29 = vector.broadcast %cst_12 : f32 to vector<8x32xf32>
    %30 = arith.addf %28, %29 : vector<8x32xf32>
    %31 = math.sqrt %30 : vector<8x32xf32>
    %c8_i32 = arith.constant 8 : i32
    %32 = arith.muli %1, %c8_i32 : i32
    %33 = tpu.iota {dimensions = array<i32: 0>} : vector<8x1xi32>
    %34 = vector.broadcast %32 : i32 to vector<8x1xi32>
    %35 = arith.addi %34, %33 : vector<8x1xi32>
    %cst_13 = arith.constant dense<0.000000e+00> : vector<8xf32>
    %36 = vector.multi_reduction <add>, %31, %cst_13 [1] : vector<8x32xf32> to vector<8xf32>
    %37 = vector.shape_cast %36 : vector<8xf32> to vector<8x1xf32>
    %c8_i32_14 = arith.constant 8 : i32
    %38 = vector.broadcast %c8_i32_14 : i32 to vector<8x1xi32>
    %39 = arith.cmpi slt, %35, %38 : vector<8x1xi32>
    %cst_15 = arith.constant 0.000000e+00 : f32
    %40 = vector.broadcast %cst_15 : f32 to vector<8x1xf32>
    %41 = arith.select %39, %37, %40 : vector<8x1xi1>, vector<8x1xf32>
    %cst_16 = arith.constant dense<0.000000e+00> : vector<1xf32>
    %42 = vector.multi_reduction <add>, %41, %cst_16 [0] : vector<8x1xf32> to vector<1xf32>
    %43 = vector.shape_cast %42 : vector<1xf32> to vector<1x1xf32>
    %c0_i32_17 = arith.constant 0 : i32
    %44 = arith.cmpi eq, %arg1, %c0_i32_17 : i32
    %45 = arith.extui %44 : i1 to i32
    %c0_i32_18 = arith.constant 0 : i32
    %46 = arith.cmpi ne, %45, %c0_i32_18 : i32
    scf.if %46 {
      %cst_23 = arith.constant 0.000000e+00 : f32
      %52 = vector.broadcast %cst_23 : f32 to vector<1x128xf32>
      %c0_24 = arith.constant 0 : index
      %c0_25 = arith.constant 0 : index
      %53 = vector.load %arg4[%c0_24, %c0_25] : memref<1x128xf32, #tpu.memory_space<vmem>>, vector<1x128xf32>
      tpu.vector_store %arg4[%c0_24, %c0_25], %52 {strides = array<i32>} : memref<1x128xf32, #tpu.memory_space<vmem>>, vector<1x128xf32>,
    } else {
    }
    %c0_19 = arith.constant 0 : index
    %c0_20 = arith.constant 0 : index
    %47 = vector.load %arg4[%c0_19, %c0_20] : memref<1x128xf32, #tpu.memory_space<vmem>>, vector<1x128xf32>
    %48 = vector.shape_cast %43 : vector<1x1xf32> to vector<1x1xf32>
    %49 = vector.broadcast %48 : vector<1x1xf32> to vector<1x128xf32>
    %50 = arith.addf %47, %49 : vector<1x128xf32>
    %c0_21 = arith.constant 0 : index
    %c0_22 = arith.constant 0 : index
    %51 = vector.load %arg4[%c0_21, %c0_22] : memref<1x128xf32, #tpu.memory_space<vmem>>, vector<1x128xf32>
    tpu.vector_store %arg4[%c0_21, %c0_22], %50 {strides = array<i32>} : memref<1x128xf32, #tpu.memory_space<vmem>>, vector<1x128xf32>,
    return
  }
  func.func @transform_0(%arg0: i32, %arg1: i32) -> (i32, i32) {
    %c1_i32 = arith.constant 1 : i32
    %0 = arith.muli %arg0, %c1_i32 : i32
    %1 = arith.addi %0, %arg1 : i32
    %c0_i32 = arith.constant 0 : i32
    %2 = arith.minsi %1, %c0_i32 : i32
    %c0_i32_0 = arith.constant 0 : i32
    %c0_i32_1 = arith.constant 0 : i32
    return %2, %c0_i32_0 : i32, i32
  }
  func.func @transform_1(%arg0: i32, %arg1: i32) -> (i32, i32) {
    %c1_i32 = arith.constant 1 : i32
    %0 = arith.muli %arg0, %c1_i32 : i32
    %1 = arith.addi %0, %arg1 : i32
    %c0_i32 = arith.constant 0 : i32
    %2 = arith.minsi %1, %c0_i32 : i32
    %c0_i32_0 = arith.constant 0 : i32
    %c0_i32_1 = arith.constant 0 : i32
    return %2, %c0_i32_0 : i32, i32
  }
  func.func @transform_2(%arg0: i32, %arg1: i32) -> (i32, i32) {
    %c0_i32 = arith.constant 0 : i32
    %c0_i32_0 = arith.constant 0 : i32
    return %c0_i32, %arg0 : i32, i32
  }
}

</mosaic_0001>

<bundles_post_ra>
// kernel: tpu_custom_call.1
= control target key start
LH: loop header
LB: loop body
LE: loop exit
PB: predicated region body
PF: predicated region fallthrough
CT: control target
= control target key end

     0   :  { %7 = vsyncpa [#allocation4], 0  ;;  %s355_s0 = inlined_call_operand.hbm [shape: f32[8,32], index: 0, kind: input, shape index: {}]   ;;  %s356_s1 = inlined_call_operand.hbm [shape: f32[8,32], index: 1, kind: input, shape index: {}]   ;;  %s357_s2 = inlined_call_operand.hbm [shape: f32[1,128], index: 2, kind: output, shape index: {}]  }
   0x1   :  { %8 = vsyncpa [#allocation7], 0 }
   0x2   :  { %9 = vsyncpa [#allocation5], 0  ;;  %s318_s9 = smov [#allocation3]   ;;  %s319_s11 = smov [#allocation6]  }
   0x3   :  { %s21_s10 = sshll.u32 %s318_s9, 4  ;;  %s36_s12 = sshll.u32 %s319_s11, 4  ;;  %s22_s10 = int_to_ptr.vmem [resolvable:$true] %s21_s10  ;;  %s37_s12 = int_to_ptr.vmem [resolvable:$true] %s36_s12 }
   0x4   :  { %s260_s13 = scalar_lea.vmem %s22_s10, 128  ;;  %p265_p1 = scmp.lt.s32.totalorder %s22_s10, %s22_s10 }
   0x5   :  { %p261_p0 = scmp.ne.s32.totalorder %s22_s10, %s260_s13  ;;  %p266_p2 = scmp.lt.s32.totalorder %s260_s13, %s260_s13 }
   0x7   :  { %p267_p3 = por %p266_p2, %p265_p1 }
   0x9   :  { %p268_p4 = pnand %p267_p3, %p261_p0 }
   0xb   :  { %271 = shalt.err (!%p268_p4)
}
   0xc   :  { %24 = dma.hbm_to_vmem [thread:$0]  %s355_s0, 128, %s22_s10, [#allocation4]  }
   0xd   :  { %s280_s16 = scalar_lea.vmem %s37_s12, 128  ;;  %p285_p6 = scmp.lt.s32.totalorder %s37_s12, %s37_s12 }
   0xe   :  { %p281_p5 = scmp.ne.s32.totalorder %s37_s12, %s280_s16  ;;  %p286_p7 = scmp.lt.s32.totalorder %s280_s16, %s280_s16 }
  0x10   :  { %p287_p8 = por %p286_p7, %p285_p6 }
  0x12   :  { %p288_p9 = pnand %p287_p8, %p281_p5 }
  0x14   :  { %291 = shalt.err (!%p288_p9)
}
  0x15   :  { %39 = dma.hbm_to_vmem [thread:$0]  %s356_s1, 128, %s37_s12, [#allocation7]  }
  0x16   :  { %312 = dma.done.wait [#allocation4], 128  }
  0x17   :  { %313 = vsyncadd [#allocation4], 4294967168 }
  0x18   :  { %314 = dma.done.wait [#allocation7], 128  }
  0x19   :  { %315 = vsyncadd [#allocation7], 4294967168  ;;  %vm72_vm0 = vcmask 261120   ;;  %v77_v0 = vld [vmem:[#allocation3] sm:$0xff]  ;;  %v79_v1 = vld [vmem:[#allocation6] sm:$0xff]  ;;  %v57_v6 = vlaneseq  ;;  %v320_v12 = vmov 0.0  }
  0x1a   :  { %v78_v2 = vmax.f32 %v77_v0, 0.0  ;;  %v80_v3 = vmax.f32 %v79_v1, 0.0  ;;  %230 = vmatprep.subr.mxu0 %v320_v12  ;;  %200 = vst [vmem:[#allocation8] sm:$0x1] %v320_v12  ;;  %vm321_vm3 = vmmov 0   ;;  %s322_s0 = smov [#allocation8]  }
  0x1b   :  { %v58_v7 = vshrl.u32 %v57_v6, 7  ;;  %v63_v9 = vand.u32 127, %v57_v6  ;;  %238 = vmatprep.mubr.msk.f32.mxu0 %vm321_vm3, %v320_v12  ;;  %s210_s1 = sshll.u32 %s322_s0, 4  ;;  %s211_s1 = int_to_ptr.vmem [resolvable:$true] %s210_s1 }
  0x1c   :  { %v82_v4 = vsel %vm72_vm0, %v78_v2, 0.0  ;;  %v88_v5 = vsel %vm72_vm0, %v80_v3, 0.0  ;;  %s292_s19 = scalar_lea.vmem %s211_s1, 16  ;;  %s296_s20 = scalar_lea.vmem %s211_s1, 32 }
  0x1d   :  { %83 = vadd.xlane.f32.xlu0 %v82_v4  ;;  %v61_v8 = vadd.s32 24, %v58_v7  ;;  %v60_v10 = vadd.s32 16, %v58_v7  ;;  %v59_v11 = vadd.s32 8, %v58_v7  ;;  %vm64_vm2 = vcmp.le.s32.totalorder %v58_v7, %v63_v9  ;;  %p293_p10 = scmp.ne.s32.totalorder %s211_s1, %s292_s19  ;;  %p297_p11 = scmp.lt.s32.totalorder %s211_s1, %s211_s1 }
  0x1e   :  { %v68_v14 = vsel %vm64_vm2, 1.0, %v320_v12  ;;  %p298_p12 = scmp.lt.s32.totalorder %s296_s20, %s292_s19 }
  0x1f   :  { %vm67_vm1 = vcmp.le.s32.totalorder %v61_v8, %v63_v9  ;;  %vm66_vm4 = vcmp.le.s32.totalorder %v60_v10, %v63_v9  ;;  %vm65_vm5 = vcmp.le.s32.totalorder %v59_v11, %v63_v9  ;;  %73 = vst.msk [vmem:[#allocation2] sm:$0xff] %vm72_vm0, %v68_v14 }
  0x20   :  { %v71_v13 = vsel %vm67_vm1, 1.0, %v320_v12  ;;  %v70_v15 = vsel %vm66_vm4, 1.0, %v320_v12  ;;  %v69_v16 = vsel %vm65_vm5, 1.0, %v320_v12  ;;  %p299_p13 = por %p298_p12, %p297_p11 }
  0x21   :  { %89 = vadd.xlane.f32.xlu0 %v88_v5  ;;  %76 = vst.msk [vmem:[#allocation2 + $0x18] sm:$0xff] %vm72_vm0, %v71_v13  ;;  %75 = vst.msk [vmem:[#allocation2 + $0x10] sm:$0xff] %vm72_vm0, %v70_v15  ;;  %v201_v46 = vld [vmem:[#allocation8] sm:$0x1] }
  0x22   :  { %74 = vst.msk [vmem:[#allocation2 + $0x8] sm:$0xff] %vm72_vm0, %v69_v16  ;;  %p300_p0 = pnand %p299_p13, %p293_p10 }
  0x26   :  { %v95_v20 = vld [vmem:[#allocation2] sm:$0xff] }
  0x28   :  { %v98_v17 = vld [vmem:[#allocation2 + $0x18] sm:$0xff]  ;;  %v97_v18 = vld [vmem:[#allocation2 + $0x10] sm:$0xff] }
  0x29   :  { %231 = vmatpush3.msra.mxu0 %v98_v17  ;;  %v96_v19 = vld [vmem:[#allocation2 + $0x8] sm:$0xff] }
  0x2a   :  { %232 = vmatprep.subr.mxu0 %v320_v12 }
  0x2b   :  { %233 = vmatpush3.msra.mxu0 %v97_v18 }
  0x2c   :  { %234 = vmatprep.subr.mxu0 %v320_v12 }
  0x2d   :  { %235 = vmatpush3.msra.mxu0 %v96_v19 }
  0x2e   :  { %236 = vmatprep.subr.mxu0 %v320_v12 }
  0x2f   :  { %237 = vmatpush3.msra.mxu0 %v95_v20 }
  0xa6   :  { %v84_v21 = vpop.xlane.xlu0 %83 }
  0xa7   :  { %v85_v22 = vmax.f32 %v84_v21, 1e-08 }
  0xa9   :  { %246 = vrcp.f32 %v85_v22 }
  0xaa   :  { %v90_v23 = vpop.xlane.xlu0 %89 }
  0xab   :  { %v91_v24 = vmax.f32 %v90_v23, 1e-08 }
  0xad   :  { %248 = vrcp.f32 %v91_v24 }
  0xb6   :  { %v247_v25 = vpop.eup %246 }
  0xb7   :  { %v87_v27 = vmul.f32 %v247_v25, %v78_v2 }
  0xba   :  { %v249_v26 = vpop.eup %248 }
  0xbb   :  { %v93_v28 = vmul.f32 %v249_v26, %v80_v3 }
  0xbd   :  { %v94_v29 = vsub.f32 %v87_v27, %v93_v28 }
  0xbf   :  { %239 = vmatmul.mubr.msk.f32.vlgmr.msra.gmra.mxu0 %vm72_vm0, %v94_v29 }
 0x17f   :  { %v168_v30 = vpop.f32.mrf.mxu0 }
 0x180   :  { %v172_v31 = vmul.f32 %v168_v30, %v168_v30 }
 0x181   :  { %v240_v32 = vpop.f32.mrf.mxu0 }
 0x182   :  { %v173_v33 = vadd.f32 1e-06, %v172_v31 }
 0x184   :  { %250 = vrsqrt.f32 %v173_v33  ;;  %vm176_vm6 = vcmp.eq.f32.partialorder %v173_v33, inf  ;;  %v179_v36 = vand.u32 2147483648, %v173_v33  ;;  %vm178_vm7 = vcmp.eq.f32.partialorder %v173_v33, 0.0 }
 0x191   :  { %v251_v34 = vpop.eup %250 }
 0x192   :  { %v175_v35 = vmul.f32 %v251_v34, %v173_v33 }
 0x194   :  { %v177_v37 = vsel %vm176_vm6, %v173_v33, %v175_v35 }
 0x195   :  { %v180_v38 = vsel %vm178_vm7, %v179_v36, %v177_v37 }
 0x196   :  { %v186_v39 = vsel %vm72_vm0, %v180_v38, 0.0 }
 0x197   :  { %187 = vadd.xlane.f32.xlu1 %v186_v39 }
 0x220   :  { %v188_v40 = vpop.xlane.xlu1 %187 }
 0x221   :  { %v191_v41 = vrot.slane %v188_v40, 4 }
 0x223   :  { %v192_v42 = vadd.f32 %v191_v41, %v188_v40 }
 0x225   :  { %v193_v43 = vrot.slane %v192_v42, 2 }
 0x227   :  { %v194_v44 = vadd.f32 %v193_v43, %v192_v42 }
 0x229   :  { %v195_v45 = vrot.slane %v194_v44, 1 }
 0x22b   :  { %v196_v47 = vadd.f32 %v195_v45, %v194_v44 }
 0x22d   :  { %v202_v48 = vadd.f32 %v201_v46, %v196_v47 }
 0x22f   :  { %203 = vst [vmem:[#allocation8] sm:$0x1] %v202_v48 }
 0x230   :  { %303 = shalt.err (!%p300_p0)
}
 0x231   :  { %213 = dma.vmem_to_hbm [thread:$0]  %s211_s1, 16, %s357_s2, [#allocation5]  }
 0x232   :  { %316 = dma.done.wait [#allocation5], 16  }
 0x233   :  { %317 = vsyncadd [#allocation5], 4294967280 }
 0x234   :  { %217 = vsyncpa [#allocation4], 1 }
 0x235   :  { %218 = vsyncpa [#allocation7], 1 }
 0x236   :  { %219 = vsyncpa [#allocation5], 1 }

</bundles_post_ra>
